<compile_context>
chip_gen: v5e
topology: v5e:2x2
jax: 0.10.0
libtpu: 0.0.40
codegen_flags: <defaults>
</compile_context>

<pallas_src>
import jax
import jax.numpy as jnp
import numpy as np
from jax.experimental import pallas as pl
from jax.experimental.pallas import tpu as pltpu


def _hutchinson_action_kernel(
    div_coef_ref,                       # SMEM (1, 1): dt*D*sum(mask/gamma)/N
    x_ref,                              # VMEM (d, TM) f32: frames on lanes
    v_ref,                              # VMEM (d, TM) bf16: +/-1 probe (0 on invalid frames)
    pv_ref,                             # VMEM (1, TM) f32: path-pair validity mask
    fv_ref,                             # VMEM (1, TM) f32: force-frame validity mask
    w1t_ref,                            # VMEM (H, d): W1^T   (forward)
    w2t_ref,                            # VMEM (d, H): W2^T   (forward)
    w2_ref,                             # VMEM (H, d): W2     (VJP)
    w1_ref,                             # VMEM (d, H): W1     (VJP)
    b1_ref,                             # VMEM (H, 1) f32
    b2_ref,                             # VMEM (d, 1) f32
    pcoef_ref,                          # VMEM (d, 1) f32: mask/(2 dt)
    fcoef_ref,                          # VMEM (d, 1) f32: mask*dt/(2 gamma^2)
    path_out_ref, force_out_ref, div_out_ref,   # SMEM (1, 1) scalar outputs
    carry_ref,                          # VMEM (d, 1) f32: previous tile's last frame
    accp_ref, accf_ref, accd_ref,       # VMEM (d, 128) f32: running partial sums
):
    i = pl.program_id(0)
    nsteps = pl.num_programs(0)

    @pl.when(i == 0)
    def _init():
        carry_ref[...] = jnp.zeros_like(carry_ref)
        accp_ref[...] = jnp.zeros_like(accp_ref)
        accf_ref[...] = jnp.zeros_like(accf_ref)
        accd_ref[...] = jnp.zeros_like(accd_ref)

    x = x_ref[...]                      # (d, TM) f32
    vmx = v_ref[...]                    # (d, TM) bf16 (exact +/-1 / 0)
    pv = pv_ref[...]                    # (1, TM) f32
    fv = fv_ref[...]                    # (1, TM) f32
    cdt = vmx.dtype                     # MXU compute dtype
    tm = x.shape[1]

    # ---- path term: per-lane previous frame via lane roll + cross-tile carry ----
    lane = jax.lax.broadcasted_iota(jnp.int32, (1, tm), 1)
    lane0 = lane == 0
    lane_f = lane.astype(jnp.float32)
    want_prev = jnp.where(lane0, jnp.float32(tm - 1), lane_f - 1.0)
    # Probe the rotate direction with an iota so the pairing is correct under
    # either rotation convention (costs one extra cheap XLU roll per tile).
    fwd_is_prev = pltpu.roll(lane_f, 1, axis=1) == want_prev
    x_prev = jnp.where(fwd_is_prev,
                       pltpu.roll(x, 1, axis=1),
                       pltpu.roll(x, tm - 1, axis=1))
    x_prev = jnp.where(lane0, carry_ref[...], x_prev)      # frame from previous tile
    diff = (x - x_prev) * pv                                # masked pairs, f32 only

    # ---- force MLP on column-major slabs (MXU, bf16 operands, f32 accumulate) ----
    xc = x.astype(cdt)
    hT = jnp.tanh(
        jnp.dot(w1t_ref[...], xc, preferred_element_type=jnp.float32) + b1_ref[...]
    )                                                                   # (H, TM) f32
    fT = jnp.dot(w2t_ref[...], hT.astype(cdt),
                 preferred_element_type=jnp.float32) + b2_ref[...]      # (d, TM) f32
    f_m = fT * fv

    # ---- Hutchinson VJP: Av^T = W1 @ ((W2 @ v^T) * (1 - h^2)) ----
    uT = jnp.dot(w2_ref[...], vmx, preferred_element_type=jnp.float32)  # (H, TM)
    gT = uT * (1.0 - hT * hT)
    AvT = jnp.dot(w1_ref[...], gT.astype(cdt),
                  preferred_element_type=jnp.float32)                   # (d, TM)
    vav = vmx.astype(jnp.float32) * AvT

    # ---- lane-preserving accumulation (VPU only); XLU reduce once at the end ----
    def fold128(t):                     # (d, TM) -> (d, 128)
        s = t[:, 0:128]
        for c in range(1, tm // 128):
            s = s + t[:, c * 128:(c + 1) * 128]
        return s

    accp_ref[...] += fold128(diff * diff)
    accf_ref[...] += fold128(f_m * f_m)
    accd_ref[...] += fold128(vav)

    carry_ref[...] = x[:, tm - 1:tm]    # last frame of this tile for the next step

    @pl.when(i == nsteps - 1)
    def _finalize():
        path_out_ref[0, 0] = jnp.sum(accp_ref[...] * pcoef_ref[...])
        force_out_ref[0, 0] = jnp.sum(accf_ref[...] * fcoef_ref[...])
        div_out_ref[0, 0] = -jnp.sum(accd_ref[...]) * div_coef_ref[0, 0]


def hutchinson_action(path, w1, b1, w2, b2, gamma, dt, D, v, mask=None,
                      N_hutch=1, block_frames=512, mxu_dtype=jnp.bfloat16):
    """Returns (path_term_sum, force_term_sum, divergence_term_sum), like the torch module.

    path: [B, P, A, 3]; v: [B, P-1, A, 3] Hutchinson +/-1 probe (torch draws it
    internally with randint; here it is an explicit input for determinism).
    """
    if block_frames % 128 != 0:
        raise ValueError("block_frames must be a multiple of 128")
    B, P, A, C = path.shape
    d = A * C
    H = w1.shape[1]
    n_frames = B * P
    TM = block_frames
    R = ((n_frames + TM - 1) // TM) * TM
    n_tiles = R // TM
    f32 = jnp.float32

    # --- frames on the lane axis: [d, R], zero-padded ---
    xT = path.astype(f32).reshape(n_frames, d).T
    xT = jnp.pad(xT, ((0, 0), (0, R - n_frames)))
    v_full = jnp.pad(v.astype(f32), ((0, 0), (0, 1), (0, 0), (0, 0)))  # zero probe at p=P-1
    vT = jnp.pad(v_full.reshape(n_frames, d).T, ((0, 0), (0, R - n_frames)))
    vT = vT.astype(mxu_dtype)                      # +/-1 / 0 are exact in bf16

    # --- per-frame validity masks (pair (f-1, f) / force frame f) ---
    frames = jnp.arange(R, dtype=jnp.int32)
    in_range = frames < n_frames
    path_valid = (((frames % P) != 0) & in_range).astype(f32).reshape(1, R)
    force_valid = (((frames % P) != (P - 1)) & in_range).astype(f32).reshape(1, R)

    # --- per-coordinate coefficients (atom mask folded in) ---
    mask_f = jnp.ones((A,), f32) if mask is None else mask.astype(f32)
    gamma_f = gamma.astype(f32)
    mask3 = jnp.repeat(mask_f, C)
    gamma3 = jnp.repeat(gamma_f, C)
    path_coef = (mask3 / (2.0 * dt)).reshape(d, 1)
    force_coef = (mask3 * dt / (2.0 * gamma3 ** 2)).reshape(d, 1)
    div_coef = (dt * D * jnp.sum(mask_f / gamma_f) / N_hutch).astype(f32).reshape(1, 1)

    # Both weight orientations are shipped (a few KiB, resident) so every
    # contraction is a standard k-major jnp.dot on the MXU.
    w1c = w1.astype(mxu_dtype)
    w2c = w2.astype(mxu_dtype)
    w1t = w1c.T
    w2t = w2c.T
    b1c = b1.reshape(H, 1).astype(f32)
    b2c = b2.reshape(d, 1).astype(f32)

    big = lambda nrow: pl.BlockSpec((nrow, TM), lambda i: (0, i))
    res = lambda shape: pl.BlockSpec(shape, lambda i: (0, 0))

    out = pl.pallas_call(
        _hutchinson_action_kernel,
        out_shape=(
            jax.ShapeDtypeStruct((1, 1), f32),
            jax.ShapeDtypeStruct((1, 1), f32),
            jax.ShapeDtypeStruct((1, 1), f32),
        ),
        grid=(n_tiles,),
        in_specs=[
            pl.BlockSpec(memory_space=pltpu.MemorySpace.SMEM),  # div_coef
            big(d),            # xT
            big(d),            # vT
            big(1),            # path_valid
            big(1),            # force_valid
            res((H, d)),       # w1t
            res((d, H)),       # w2t
            res((H, d)),       # w2
            res((d, H)),       # w1
            res((H, 1)),       # b1
            res((d, 1)),       # b2
            res((d, 1)),       # path_coef
            res((d, 1)),       # force_coef
        ],
        out_specs=(
            pl.BlockSpec(memory_space=pltpu.MemorySpace.SMEM),
            pl.BlockSpec(memory_space=pltpu.MemorySpace.SMEM),
            pl.BlockSpec(memory_space=pltpu.MemorySpace.SMEM),
        ),
        scratch_shapes=[
            pltpu.VMEM((d, 1), f32),      # carry: previous tile's last frame
            pltpu.VMEM((d, 128), f32),    # acc path
            pltpu.VMEM((d, 128), f32),    # acc force
            pltpu.VMEM((d, 128), f32),    # acc divergence
        ],
        compiler_params=pltpu.CompilerParams(
            dimension_semantics=("arbitrary",),
            vmem_limit_bytes=32 * 1024 * 1024,
        ),
        cost_estimate=pl.CostEstimate(
            flops=8 * d * H * R,
            transcendentals=H * R,
            bytes_accessed=int(xT.size) * 4 + int(vT.size) * 2 + 8 * R + 8 * d * H + 12,
        ),
    )(
        div_coef, xT, vT, path_valid, force_valid,
        w1t, w2t, w2c, w1c, b1c, b2c, path_coef, force_coef,
    )
    return out[0][0, 0], out[1][0, 0], out[2][0, 0]


def _reference(path, w1, b1, w2, b2, gamma, dt, D, v):
    """Pure-JAX f32 reference mirroring the torch forward (autodiff VJP for Hutchinson)."""
    B, P, A, C = path.shape
    d = A * C
    x0 = path[:, :-1]

    def force_fn(x):
        xf = x.reshape(x.shape[0], x.shape[1], d)
        h = jnp.tanh(xf @ w1 + b1)
        f = h @ w2 + b2
        return f.reshape(x.shape)

    forces, vjp_fn = jax.vjp(force_fn, x0)
    (Av,) = vjp_fn(v)
    laplace = -jnp.sum(v * Av)

    g = gamma.reshape(1, 1, A, 1)
    path_term = (path[:, 1:] - x0) ** 2 / (2.0 * dt)
    force_term = forces ** 2 * (dt / (2.0 * g ** 2))
    div_term = laplace * dt * D / gamma
    return path_term.sum(), force_term.sum(), div_term.sum()


if __name__ == "__main__":
    # Small shapes consistent with the module: path [B, P, A, 3].
    # block_frames=128 makes the kernel run 3 grid steps (multi-tile path:
    # carry across tiles, batch-boundary masking, end-of-array padding).
    B, P, A, C, H = 2, 160, 8, 3, 32
    d = A * C
    dt, D = 0.01, 1.0

    key = jax.random.PRNGKey(0)
    k_path, k_w1, k_b1, k_w2, k_b2, k_v = jax.random.split(key, 6)

    path = jax.random.normal(k_path, (B, P, A, C), dtype=jnp.float32)
    # Deterministic synthetic force_func parameters (per-frame MLP).  W2 is
    # correlated with W1^T so the Hutchinson divergence is well away from zero.
    w1 = 0.1 * jax.random.normal(k_w1, (d, H), dtype=jnp.float32)
    b1 = 0.1 * jax.random.normal(k_b1, (H,), dtype=jnp.float32)
    w2 = 0.05 * jax.random.normal(k_w2, (H, d), dtype=jnp.float32) + 0.3 * w1.T
    b2 = 0.05 * jax.random.normal(k_b2, (d,), dtype=jnp.float32)
    gamma = jnp.linspace(0.5, 2.0, A).astype(jnp.float32)

    # Hutchinson +/-1 probe (torch uses randint; deterministic here via PRNGKey).
    v = (jax.random.bernoulli(k_v, 0.5, (B, P - 1, A, C)).astype(jnp.float32) * 2.0 - 1.0)

    path_s, force_s, div_s = hutchinson_action(
        path, w1, b1, w2, b2, gamma, dt, D, v, block_frames=128)
    jax.block_until_ready((path_s, force_s, div_s))

    ref_path, ref_force, ref_div = _reference(path, w1, b1, w2, b2, gamma, dt, D, v)

    # Path term is pure f32 (tight); force/divergence use bf16 MXU operands.
    np.testing.assert_allclose(np.asarray(path_s), np.asarray(ref_path), rtol=1e-3, atol=1e-3)
    np.testing.assert_allclose(np.asarray(force_s), np.asarray(ref_force), rtol=3e-2, atol=5e-3)
    np.testing.assert_allclose(np.asarray(div_s), np.asarray(ref_div), rtol=3e-2, atol=5e-2)

    print("KERNEL_OK")
</pallas_src>

<mosaic_0001>
module attributes {stable_mosaic.version = 11 : i64} {
  func.func @_hutchinson_action_kernel(%arg0: i32, %arg1: memref<1x1xf32, #tpu.memory_space<smem>>, %arg2: memref<24x128xf32, #tpu.memory_space<vmem>>, %arg3: memref<24x128xbf16, #tpu.memory_space<vmem>>, %arg4: memref<1x128xf32, #tpu.memory_space<vmem>>, %arg5: memref<1x128xf32, #tpu.memory_space<vmem>>, %arg6: memref<32x24xbf16, #tpu.memory_space<vmem>>, %arg7: memref<24x32xbf16, #tpu.memory_space<vmem>>, %arg8: memref<32x24xbf16, #tpu.memory_space<vmem>>, %arg9: memref<24x32xbf16, #tpu.memory_space<vmem>>, %arg10: memref<32x1xf32, #tpu.memory_space<vmem>>, %arg11: memref<24x1xf32, #tpu.memory_space<vmem>>, %arg12: memref<24x1xf32, #tpu.memory_space<vmem>>, %arg13: memref<24x1xf32, #tpu.memory_space<vmem>>, %arg14: memref<1x1xf32, #tpu.memory_space<smem>>, %arg15: memref<1x1xf32, #tpu.memory_space<smem>>, %arg16: memref<1x1xf32, #tpu.memory_space<smem>>, %arg17: memref<24x1xf32, #tpu.memory_space<vmem>>, %arg18: memref<24x128xf32, #tpu.memory_space<vmem>>, %arg19: memref<24x128xf32, #tpu.memory_space<vmem>>, %arg20: memref<24x128xf32, #tpu.memory_space<vmem>>) attributes {dimension_semantics = [#tpu.dimension_semantics<arbitrary>], iteration_bounds = array<i64: 3>, scalar_prefetch = 0 : i64, scratch_operands = 4 : i64, tpu.core_type = #tpu.core_type<tc>, window_params = [{transform_indices = @transform_0, window_bounds = array<i64: 1, 1>}, {transform_indices = @transform_1, window_bounds = array<i64: 24, 128>}, {transform_indices = @transform_2, window_bounds = array<i64: 24, 128>}, {transform_indices = @transform_3, window_bounds = array<i64: 1, 128>}, {transform_indices = @transform_4, window_bounds = array<i64: 1, 128>}, {pipeline_mode = #tpu.pipeline_mode<synchronous>, transform_indices = @transform_5, window_bounds = array<i64: 32, 24>}, {pipeline_mode = #tpu.pipeline_mode<synchronous>, transform_indices = @transform_6, window_bounds = array<i64: 24, 32>}, {pipeline_mode = #tpu.pipeline_mode<synchronous>, transform_indices = @transform_7, window_bounds = array<i64: 32, 24>}, {pipeline_mode = #tpu.pipeline_mode<synchronous>, transform_indices = @transform_8, window_bounds = array<i64: 24, 32>}, {pipeline_mode = #tpu.pipeline_mode<synchronous>, transform_indices = @transform_9, window_bounds = array<i64: 32, 1>}, {pipeline_mode = #tpu.pipeline_mode<synchronous>, transform_indices = @transform_10, window_bounds = array<i64: 24, 1>}, {pipeline_mode = #tpu.pipeline_mode<synchronous>, transform_indices = @transform_11, window_bounds = array<i64: 24, 1>}, {pipeline_mode = #tpu.pipeline_mode<synchronous>, transform_indices = @transform_12, window_bounds = array<i64: 24, 1>}, {transform_indices = @transform_13, window_bounds = array<i64: 1, 1>}, {transform_indices = @transform_14, window_bounds = array<i64: 1, 1>}, {transform_indices = @transform_15, window_bounds = array<i64: 1, 1>}]} {
    %c0_i32 = arith.constant 0 : i32
    %0 = arith.cmpi eq, %arg0, %c0_i32 : i32
    %1 = arith.extui %0 : i1 to i32
    %c0_i32_0 = arith.constant 0 : i32
    %2 = arith.cmpi ne, %1, %c0_i32_0 : i32
    scf.if %2 {
      %cst_45 = arith.constant 0.000000e+00 : f32
      %73 = vector.broadcast %cst_45 : f32 to vector<24x1xf32>
      %c0_46 = arith.constant 0 : index
      %c0_47 = arith.constant 0 : index
      %74 = vector.load %arg17[%c0_46, %c0_47] : memref<24x1xf32, #tpu.memory_space<vmem>>, vector<24x1xf32>
      tpu.vector_store %arg17[%c0_46, %c0_47], %73 {strides = array<i32>} : memref<24x1xf32, #tpu.memory_space<vmem>>, vector<24x1xf32>,
      %cst_48 = arith.constant 0.000000e+00 : f32
      %75 = vector.broadcast %cst_48 : f32 to vector<24x128xf32>
      %c0_49 = arith.constant 0 : index
      %c0_50 = arith.constant 0 : index
      %76 = vector.load %arg18[%c0_49, %c0_50] : memref<24x128xf32, #tpu.memory_space<vmem>>, vector<24x128xf32>
      tpu.vector_store %arg18[%c0_49, %c0_50], %75 {strides = array<i32>} : memref<24x128xf32, #tpu.memory_space<vmem>>, vector<24x128xf32>,
      %cst_51 = arith.constant 0.000000e+00 : f32
      %77 = vector.broadcast %cst_51 : f32 to vector<24x128xf32>
      %c0_52 = arith.constant 0 : index
      %c0_53 = arith.constant 0 : index
      %78 = vector.load %arg19[%c0_52, %c0_53] : memref<24x128xf32, #tpu.memory_space<vmem>>, vector<24x128xf32>
      tpu.vector_store %arg19[%c0_52, %c0_53], %77 {strides = array<i32>} : memref<24x128xf32, #tpu.memory_space<vmem>>, vector<24x128xf32>,
      %cst_54 = arith.constant 0.000000e+00 : f32
      %79 = vector.broadcast %cst_54 : f32 to vector<24x128xf32>
      %c0_55 = arith.constant 0 : index
      %c0_56 = arith.constant 0 : index
      %80 = vector.load %arg20[%c0_55, %c0_56] : memref<24x128xf32, #tpu.memory_space<vmem>>, vector<24x128xf32>
      tpu.vector_store %arg20[%c0_55, %c0_56], %79 {strides = array<i32>} : memref<24x128xf32, #tpu.memory_space<vmem>>, vector<24x128xf32>,
    } else {
    }
    %c0 = arith.constant 0 : index
    %c0_1 = arith.constant 0 : index
    %3 = vector.load %arg2[%c0, %c0_1] : memref<24x128xf32, #tpu.memory_space<vmem>>, vector<24x128xf32>
    %c0_2 = arith.constant 0 : index
    %c0_3 = arith.constant 0 : index
    %4 = vector.load %arg3[%c0_2, %c0_3] : memref<24x128xbf16, #tpu.memory_space<vmem>>, vector<24x128xbf16>
    %c0_4 = arith.constant 0 : index
    %c0_5 = arith.constant 0 : index
    %5 = vector.load %arg4[%c0_4, %c0_5] : memref<1x128xf32, #tpu.memory_space<vmem>>, vector<1x128xf32>
    %c0_6 = arith.constant 0 : index
    %c0_7 = arith.constant 0 : index
    %6 = vector.load %arg5[%c0_6, %c0_7] : memref<1x128xf32, #tpu.memory_space<vmem>>, vector<1x128xf32>
    %7 = tpu.iota {dimensions = array<i32: 1>} : vector<1x128xi32>
    %c0_i32_8 = arith.constant 0 : i32
    %8 = vector.broadcast %c0_i32_8 : i32 to vector<1x128xi32>
    %9 = arith.cmpi eq, %7, %8 : vector<1x128xi32>
    %10 = arith.sitofp %7 : vector<1x128xi32> to vector<1x128xf32>
    %cst = arith.constant 1.000000e+00 : f32
    %11 = vector.broadcast %cst : f32 to vector<1x128xf32>
    %12 = arith.subf %10, %11 : vector<1x128xf32>
    %cst_9 = arith.constant 1.270000e+02 : f32
    %13 = vector.broadcast %cst_9 : f32 to vector<1x128xf32>
    %14 = arith.select %9, %13, %12 : vector<1x128xi1>, vector<1x128xf32>
    %c1_i32 = arith.constant 1 : i32
    %15 = tpu.dynamic_rotate %10 by %c1_i32 dim 1 : vector<1x128xf32>, i32 -> vector<1x128xf32>
    %16 = arith.cmpf oeq, %15, %14 : vector<1x128xf32>
    %c1_i32_10 = arith.constant 1 : i32
    %17 = tpu.dynamic_rotate %3 by %c1_i32_10 dim 1 : vector<24x128xf32>, i32 -> vector<24x128xf32>
    %c127_i32 = arith.constant 127 : i32
    %18 = tpu.dynamic_rotate %3 by %c127_i32 dim 1 : vector<24x128xf32>, i32 -> vector<24x128xf32>
    %19 = vector.shape_cast %16 : vector<1x128xi1> to vector<1x128xi1>
    %20 = vector.broadcast %19 : vector<1x128xi1> to vector<24x128xi1>
    %21 = arith.select %20, %17, %18 : vector<24x128xi1>, vector<24x128xf32>
    %c0_11 = arith.constant 0 : index
    %c0_12 = arith.constant 0 : index
    %22 = vector.load %arg17[%c0_11, %c0_12] : memref<24x1xf32, #tpu.memory_space<vmem>>, vector<24x1xf32>
    %23 = vector.shape_cast %9 : vector<1x128xi1> to vector<1x128xi1>
    %24 = vector.broadcast %23 : vector<1x128xi1> to vector<24x128xi1>
    %25 = vector.shape_cast %22 : vector<24x1xf32> to vector<24x1xf32>
    %26 = vector.broadcast %25 : vector<24x1xf32> to vector<24x128xf32>
    %27 = arith.select %24, %26, %21 : vector<24x128xi1>, vector<24x128xf32>
    %28 = arith.subf %3, %27 : vector<24x128xf32>
    %29 = vector.broadcast %5 : vector<1x128xf32> to vector<24x128xf32>
    %30 = arith.mulf %28, %29 : vector<24x128xf32>
    %31 = arith.truncf %3 : vector<24x128xf32> to vector<24x128xbf16>
    %c0_13 = arith.constant 0 : index
    %c0_14 = arith.constant 0 : index
    %32 = vector.load %arg6[%c0_13, %c0_14] : memref<32x24xbf16, #tpu.memory_space<vmem>>, vector<32x24xbf16>
    %cst_15 = arith.constant dense<0.000000e+00> : vector<32x128xf32>
    %33 = tpu.matmul %32, %31, %cst_15 {dimension_numbers = #tpu.dot_dimension_numbers<[1], [0], [0], [1], [0, 0, 1, 1], [], []>} : vector<32x24xbf16>, vector<24x128xbf16>, vector<32x128xf32> -> vector<32x128xf32>
    %c0_16 = arith.constant 0 : index
    %c0_17 = arith.constant 0 : index
    %34 = vector.load %arg10[%c0_16, %c0_17] : memref<32x1xf32, #tpu.memory_space<vmem>>, vector<32x1xf32>
    %35 = vector.broadcast %34 : vector<32x1xf32> to vector<32x128xf32>
    %36 = arith.addf %33, %35 : vector<32x128xf32>
    %37 = math.tanh %36 : vector<32x128xf32>
    %c0_18 = arith.constant 0 : index
    %c0_19 = arith.constant 0 : index
    %38 = vector.load %arg7[%c0_18, %c0_19] : memref<24x32xbf16, #tpu.memory_space<vmem>>, vector<24x32xbf16>
    %39 = arith.truncf %37 : vector<32x128xf32> to vector<32x128xbf16>
    %cst_20 = arith.constant dense<0.000000e+00> : vector<24x128xf32>
    %40 = tpu.matmul %38, %39, %cst_20 {dimension_numbers = #tpu.dot_dimension_numbers<[1], [0], [0], [1], [0, 0, 1, 1], [], []>} : vector<24x32xbf16>, vector<32x128xbf16>, vector<24x128xf32> -> vector<24x128xf32>
    %c0_21 = arith.constant 0 : index
    %c0_22 = arith.constant 0 : index
    %41 = vector.load %arg11[%c0_21, %c0_22] : memref<24x1xf32, #tpu.memory_space<vmem>>, vector<24x1xf32>
    %42 = vector.broadcast %41 : vector<24x1xf32> to vector<24x128xf32>
    %43 = arith.addf %40, %42 : vector<24x128xf32>
    %44 = vector.broadcast %6 : vector<1x128xf32> to vector<24x128xf32>
    %45 = arith.mulf %43, %44 : vector<24x128xf32>
    %c0_23 = arith.constant 0 : index
    %c0_24 = arith.constant 0 : index
    %46 = vector.load %arg8[%c0_23, %c0_24] : memref<32x24xbf16, #tpu.memory_space<vmem>>, vector<32x24xbf16>
    %cst_25 = arith.constant dense<0.000000e+00> : vector<32x128xf32>
    %47 = tpu.matmul %46, %4, %cst_25 {dimension_numbers = #tpu.dot_dimension_numbers<[1], [0], [0], [1], [0, 0, 1, 1], [], []>} : vector<32x24xbf16>, vector<24x128xbf16>, vector<32x128xf32> -> vector<32x128xf32>
    %48 = arith.mulf %37, %37 : vector<32x128xf32>
    %cst_26 = arith.constant 1.000000e+00 : f32
    %49 = vector.broadcast %cst_26 : f32 to vector<32x128xf32>
    %50 = arith.subf %49, %48 : vector<32x128xf32>
    %51 = arith.mulf %47, %50 : vector<32x128xf32>
    %c0_27 = arith.constant 0 : index
    %c0_28 = arith.constant 0 : index
    %52 = vector.load %arg9[%c0_27, %c0_28] : memref<24x32xbf16, #tpu.memory_space<vmem>>, vector<24x32xbf16>
    %53 = arith.truncf %51 : vector<32x128xf32> to vector<32x128xbf16>
    %cst_29 = arith.constant dense<0.000000e+00> : vector<24x128xf32>
    %54 = tpu.matmul %52, %53, %cst_29 {dimension_numbers = #tpu.dot_dimension_numbers<[1], [0], [0], [1], [0, 0, 1, 1], [], []>} : vector<24x32xbf16>, vector<32x128xbf16>, vector<24x128xf32> -> vector<24x128xf32>
    %55 = arith.extf %4 : vector<24x128xbf16> to vector<24x128xf32>
    %56 = arith.mulf %55, %54 : vector<24x128xf32>
    %c0_30 = arith.constant 0 : index
    %c0_31 = arith.constant 0 : index
    %57 = vector.load %arg18[%c0_30, %c0_31] : memref<24x128xf32, #tpu.memory_space<vmem>>, vector<24x128xf32>
    %58 = arith.mulf %30, %30 : vector<24x128xf32>
    %59 = arith.addf %57, %58 : vector<24x128xf32>
    %c0_32 = arith.constant 0 : index
    %c0_33 = arith.constant 0 : index
    %60 = vector.load %arg18[%c0_32, %c0_33] : memref<24x128xf32, #tpu.memory_space<vmem>>, vector<24x128xf32>
    tpu.vector_store %arg18[%c0_32, %c0_33], %59 {strides = array<i32>} : memref<24x128xf32, #tpu.memory_space<vmem>>, vector<24x128xf32>,
    %c0_34 = arith.constant 0 : index
    %c0_35 = arith.constant 0 : index
    %61 = vector.load %arg19[%c0_34, %c0_35] : memref<24x128xf32, #tpu.memory_space<vmem>>, vector<24x128xf32>
    %62 = arith.mulf %45, %45 : vector<24x128xf32>
    %63 = arith.addf %61, %62 : vector<24x128xf32>
    %c0_36 = arith.constant 0 : index
    %c0_37 = arith.constant 0 : index
    %64 = vector.load %arg19[%c0_36, %c0_37] : memref<24x128xf32, #tpu.memory_space<vmem>>, vector<24x128xf32>
    tpu.vector_store %arg19[%c0_36, %c0_37], %63 {strides = array<i32>} : memref<24x128xf32, #tpu.memory_space<vmem>>, vector<24x128xf32>,
    %c0_38 = arith.constant 0 : index
    %c0_39 = arith.constant 0 : index
    %65 = vector.load %arg20[%c0_38, %c0_39] : memref<24x128xf32, #tpu.memory_space<vmem>>, vector<24x128xf32>
    %66 = arith.addf %65, %56 : vector<24x128xf32>
    %c0_40 = arith.constant 0 : index
    %c0_41 = arith.constant 0 : index
    %67 = vector.load %arg20[%c0_40, %c0_41] : memref<24x128xf32, #tpu.memory_space<vmem>>, vector<24x128xf32>
    tpu.vector_store %arg20[%c0_40, %c0_41], %66 {strides = array<i32>} : memref<24x128xf32, #tpu.memory_space<vmem>>, vector<24x128xf32>,
    %68 = vector.extract_strided_slice %3 {offsets = [0, 127], sizes = [24, 1], strides = [1, 1]} : vector<24x128xf32> to vector<24x1xf32>
    %c0_42 = arith.constant 0 : index
    %c0_43 = arith.constant 0 : index
    %69 = vector.load %arg17[%c0_42, %c0_43] : memref<24x1xf32, #tpu.memory_space<vmem>>, vector<24x1xf32>
    tpu.vector_store %arg17[%c0_42, %c0_43], %68 {strides = array<i32>} : memref<24x1xf32, #tpu.memory_space<vmem>>, vector<24x1xf32>,
    %c2_i32 = arith.constant 2 : i32
    %70 = arith.cmpi eq, %arg0, %c2_i32 : i32
    %71 = arith.extui %70 : i1 to i32
    %c0_i32_44 = arith.constant 0 : i32
    %72 = arith.cmpi ne, %71, %c0_i32_44 : i32
    scf.if %72 {
      %c0_45 = arith.constant 0 : index
      %c0_46 = arith.constant 0 : index
      %73 = vector.load %arg18[%c0_45, %c0_46] : memref<24x128xf32, #tpu.memory_space<vmem>>, vector<24x128xf32>
      %c0_47 = arith.constant 0 : index
      %c0_48 = arith.constant 0 : index
      %74 = vector.load %arg12[%c0_47, %c0_48] : memref<24x1xf32, #tpu.memory_space<vmem>>, vector<24x1xf32>
      %75 = vector.broadcast %74 : vector<24x1xf32> to vector<24x128xf32>
      %76 = arith.mulf %73, %75 : vector<24x128xf32>
      %77 = vector.shape_cast %76 : vector<24x128xf32> to vector<1x24x128xf32>
      %cst_49 = arith.constant dense<0.000000e+00> : vector<1xf32>
      %78 = vector.multi_reduction <add>, %77, %cst_49 [1, 2] : vector<1x24x128xf32> to vector<1xf32>
      %79 = vector.shape_cast %78 : vector<1xf32> to vector<1x1x1xf32>
      %80 = vector.extract %79[0, 0, 0] : f32 from vector<1x1x1xf32>
      %c0_50 = arith.constant 0 : index
      %c0_51 = arith.constant 0 : index
      %81 = memref.load %arg14[%c0_50, %c0_51] : memref<1x1xf32, #tpu.memory_space<smem>>
      memref.store %80, %arg14[%c0_50, %c0_51] : memref<1x1xf32, #tpu.memory_space<smem>>
      %c0_52 = arith.constant 0 : index
      %c0_53 = arith.constant 0 : index
      %82 = vector.load %arg19[%c0_52, %c0_53] : memref<24x128xf32, #tpu.memory_space<vmem>>, vector<24x128xf32>
      %c0_54 = arith.constant 0 : index
      %c0_55 = arith.constant 0 : index
      %83 = vector.load %arg13[%c0_54, %c0_55] : memref<24x1xf32, #tpu.memory_space<vmem>>, vector<24x1xf32>
      %84 = vector.broadcast %83 : vector<24x1xf32> to vector<24x128xf32>
      %85 = arith.mulf %82, %84 : vector<24x128xf32>
      %86 = vector.shape_cast %85 : vector<24x128xf32> to vector<1x24x128xf32>
      %cst_56 = arith.constant dense<0.000000e+00> : vector<1xf32>
      %87 = vector.multi_reduction <add>, %86, %cst_56 [1, 2] : vector<1x24x128xf32> to vector<1xf32>
      %88 = vector.shape_cast %87 : vector<1xf32> to vector<1x1x1xf32>
      %89 = vector.extract %88[0, 0, 0] : f32 from vector<1x1x1xf32>
      %c0_57 = arith.constant 0 : index
      %c0_58 = arith.constant 0 : index
      %90 = memref.load %arg15[%c0_57, %c0_58] : memref<1x1xf32, #tpu.memory_space<smem>>
      memref.store %89, %arg15[%c0_57, %c0_58] : memref<1x1xf32, #tpu.memory_space<smem>>
      %c0_59 = arith.constant 0 : index
      %c0_60 = arith.constant 0 : index
      %91 = vector.load %arg20[%c0_59, %c0_60] : memref<24x128xf32, #tpu.memory_space<vmem>>, vector<24x128xf32>
      %92 = vector.shape_cast %91 : vector<24x128xf32> to vector<1x24x128xf32>
      %cst_61 = arith.constant dense<0.000000e+00> : vector<1xf32>
      %93 = vector.multi_reduction <add>, %92, %cst_61 [1, 2] : vector<1x24x128xf32> to vector<1xf32>
      %94 = vector.shape_cast %93 : vector<1xf32> to vector<1x1x1xf32>
      %95 = vector.extract %94[0, 0, 0] : f32 from vector<1x1x1xf32>
      %cst_62 = arith.constant 0.000000e+00 : f32
      %96 = arith.subf %cst_62, %95 : f32
      %c0_63 = arith.constant 0 : index
      %c0_64 = arith.constant 0 : index
      %97 = memref.load %arg1[%c0_63, %c0_64] : memref<1x1xf32, #tpu.memory_space<smem>>
      %98 = arith.mulf %96, %97 : f32
      %c0_65 = arith.constant 0 : index
      %c0_66 = arith.constant 0 : index
      %99 = memref.load %arg16[%c0_65, %c0_66] : memref<1x1xf32, #tpu.memory_space<smem>>
      memref.store %98, %arg16[%c0_65, %c0_66] : memref<1x1xf32, #tpu.memory_space<smem>>
    } else {
    }
    return
  }
  func.func @transform_0(%arg0: i32) -> (i32, i32) {
    %c0_i32 = arith.constant 0 : i32
    %c0_i32_0 = arith.constant 0 : i32
    %c0_i32_1 = arith.constant 0 : i32
    return %c0_i32, %c0_i32_0 : i32, i32
  }
  func.func @transform_1(%arg0: i32) -> (i32, i32) {
    %c0_i32 = arith.constant 0 : i32
    %c0_i32_0 = arith.constant 0 : i32
    return %c0_i32, %arg0 : i32, i32
  }
  func.func @transform_2(%arg0: i32) -> (i32, i32) {
    %c0_i32 = arith.constant 0 : i32
    %c0_i32_0 = arith.constant 0 : i32
    return %c0_i32, %arg0 : i32, i32
  }
  func.func @transform_3(%arg0: i32) -> (i32, i32) {
    %c0_i32 = arith.constant 0 : i32
    %c0_i32_0 = arith.constant 0 : i32
    return %c0_i32, %arg0 : i32, i32
  }
  func.func @transform_4(%arg0: i32) -> (i32, i32) {
    %c0_i32 = arith.constant 0 : i32
    %c0_i32_0 = arith.constant 0 : i32
    return %c0_i32, %arg0 : i32, i32
  }
  func.func @transform_5(%arg0: i32) -> (i32, i32) {
    %c0_i32 = arith.constant 0 : i32
    %c0_i32_0 = arith.constant 0 : i32
    %c0_i32_1 = arith.constant 0 : i32
    return %c0_i32, %c0_i32_0 : i32, i32
  }
  func.func @transform_6(%arg0: i32) -> (i32, i32) {
    %c0_i32 = arith.constant 0 : i32
    %c0_i32_0 = arith.constant 0 : i32
    %c0_i32_1 = arith.constant 0 : i32
    return %c0_i32, %c0_i32_0 : i32, i32
  }
  func.func @transform_7(%arg0: i32) -> (i32, i32) {
    %c0_i32 = arith.constant 0 : i32
    %c0_i32_0 = arith.constant 0 : i32
    %c0_i32_1 = arith.constant 0 : i32
    return %c0_i32, %c0_i32_0 : i32, i32
  }
  func.func @transform_8(%arg0: i32) -> (i32, i32) {
    %c0_i32 = arith.constant 0 : i32
    %c0_i32_0 = arith.constant 0 : i32
    %c0_i32_1 = arith.constant 0 : i32
    return %c0_i32, %c0_i32_0 : i32, i32
  }
  func.func @transform_9(%arg0: i32) -> (i32, i32) {
    %c0_i32 = arith.constant 0 : i32
    %c0_i32_0 = arith.constant 0 : i32
    %c0_i32_1 = arith.constant 0 : i32
    return %c0_i32, %c0_i32_0 : i32, i32
  }
  func.func @transform_10(%arg0: i32) -> (i32, i32) {
    %c0_i32 = arith.constant 0 : i32
    %c0_i32_0 = arith.constant 0 : i32
    %c0_i32_1 = arith.constant 0 : i32
    return %c0_i32, %c0_i32_0 : i32, i32
  }
  func.func @transform_11(%arg0: i32) -> (i32, i32) {
    %c0_i32 = arith.constant 0 : i32
    %c0_i32_0 = arith.constant 0 : i32
    %c0_i32_1 = arith.constant 0 : i32
    return %c0_i32, %c0_i32_0 : i32, i32
  }
  func.func @transform_12(%arg0: i32) -> (i32, i32) {
    %c0_i32 = arith.constant 0 : i32
    %c0_i32_0 = arith.constant 0 : i32
    %c0_i32_1 = arith.constant 0 : i32
    return %c0_i32, %c0_i32_0 : i32, i32
  }
  func.func @transform_13(%arg0: i32) -> (i32, i32) {
    %c0_i32 = arith.constant 0 : i32
    %c0_i32_0 = arith.constant 0 : i32
    %c0_i32_1 = arith.constant 0 : i32
    return %c0_i32, %c0_i32_0 : i32, i32
  }
  func.func @transform_14(%arg0: i32) -> (i32, i32) {
    %c0_i32 = arith.constant 0 : i32
    %c0_i32_0 = arith.constant 0 : i32
    %c0_i32_1 = arith.constant 0 : i32
    return %c0_i32, %c0_i32_0 : i32, i32
  }
  func.func @transform_15(%arg0: i32) -> (i32, i32) {
    %c0_i32 = arith.constant 0 : i32
    %c0_i32_0 = arith.constant 0 : i32
    %c0_i32_1 = arith.constant 0 : i32
    return %c0_i32, %c0_i32_0 : i32, i32
  }
}

</mosaic_0001>

<bundles_post_ra>
// kernel: tpu_custom_call.1
= control target key start
LH: loop header
LB: loop body
LE: loop exit
PB: predicated region body
PF: predicated region fallthrough
CT: control target
= control target key end

     0   :  { %s1778_s0 = inlined_call_operand.<no memory space> [shape: f32[1,1], index: 0, kind: input, shape index: {}]   ;;  %s1779_s1 = inlined_call_operand.vmem [shape: f32[24,384], index: 1, kind: input, shape index: {}]   ;;  %s1780_s2 = inlined_call_operand.vmem [shape: bf16[24,384], index: 2, kind: input, shape index: {}]   ;;  %s1781_s3 = inlined_call_operand.vmem [shape: f32[1,384], index: 3, kind: input, shape index: {}]   ;;  %s1782_s4 = inlined_call_operand.vmem [shape: f32[1,384], index: 4, kind: input, shape index: {}]   ;;  %s1783_s5 = inlined_call_operand.vmem [shape: bf16[32,24], index: 5, kind: input, shape index: {}]   ;;  %s1784_s6 = inlined_call_operand.vmem [shape: bf16[24,32], index: 6, kind: input, shape index: {}]   ;;  %s1785_s7 = inlined_call_operand.vmem [shape: bf16[32,24], index: 7, kind: input, shape index: {}]   ;;  %s1786_s8 = inlined_call_operand.vmem [shape: bf16[24,32], index: 8, kind: input, shape index: {}]   ;;  %s1787_s9 = inlined_call_operand.vmem [shape: f32[32,1], index: 9, kind: input, shape index: {}]   ;;  %s1788_s10 = inlined_call_operand.vmem [shape: f32[24,1], index: 10, kind: input, shape index: {}]   ;;  %s1789_s11 = inlined_call_operand.vmem [shape: f32[24,1], index: 11, kind: input, shape index: {}]   ;;  %s1790_s12 = inlined_call_operand.vmem [shape: f32[24,1], index: 12, kind: input, shape index: {}]   ;;  %s1791_s13 = inlined_call_operand.hbm [shape: f32[1,1], index: 13, kind: output, shape index: {0}]   ;;  %s1792_s14 = inlined_call_operand.hbm [shape: f32[1,1], index: 14, kind: output, shape index: {1}]   ;;  %s1793_s15 = inlined_call_operand.hbm [shape: f32[1,1], index: 15, kind: output, shape index: {2}]  }
   0x1   :  { %21 = sst [smem:[#allocation6]] %s1778_s0 }
   0x2   :  { %22 = vsyncpa [#allocation10], 0 }
   0x3   :  { %23 = vsyncpa [#allocation12], 0  ;;  %s1526_s20 = smov 0   ;;  %s1528_s21 = smov 0  }
   0x4   :  { %s1530_s22 = smov 0  }
   0x5 LB: > { %s1542_s0 = sadd.s32 4294967295, %s1433_s22   ;;  %s1545_s23 = sadd.s32 1, %s1433_s22   ;;  %s1433_s22 = sphi %s1530_s22, %s1801_s22   ;;  %s1429_s21 = sphi %s1528_s21, %s1804_s21   ;;  %s1425_s20 = sphi %s1526_s20, %s1803_s20  }
   0x6   : > { %1796 = sst [smem:[#allocation16_spill]] %s1545_s23  ;;  %s54_s24 = ssub.s32 %s1433_s22, %s1545_s23 }
   0x7   : > { %s57_s25 = sadd.s32 1, %s1429_s21  ;;  %p55_p0 = scmp.eq.s32.totalorder %s54_s24, 0 }
   0x8   : > { %p64_p1 = scmp.ne.s32.totalorder %s1429_s21, %s1425_s20  ;;  %p65_p2 = scmp.eq.s32.totalorder %s1433_s22, 0 }
   0x9   : > { %s1554_s26 = scalar_select %p55_p0, %s1429_s21, %s57_s25  }
   0xa   : > { %p1556_p3 = por %p65_p2, %p64_p1  ;;  %p1227_p4 = scmp.ge.s32.totalorder %s1433_s22, 3 }
   0xb   : > { %1797 = sst [smem:[#allocation17_spill]] %s1554_s26 }
   0xc   : > { %426 = sbr.rel (%p1227_p4) target bundleno = 32 (0x20), region = 52 }
  0x11   : > { %429 = sbr.rel (!%p1556_p3) target bundleno = 24 (0x18), region = 56  ;;  %s431_s28 = sand.u32 (%p1556_p3), 1, %s1429_s21  }
  0x12   : > { %s1228_s29 = sshll.u32 (%p1556_p3), %s1433_s22, 3  ;;  %s1285_s30 = smul.u32 (%p1556_p3), 24, %s431_s28 }
  0x13   : > { %s435_s18 = scalar_lea.vmem (%p1556_p3), %s1779_s1, %s1228_s29 }
  0x14   : > { %v468_v0 = vld [vmem:[%s435_s18] sm:$0xff] (%p1556_p3)  ;;  %v470_v1 = vld [vmem:[%s435_s18 + $0x18] sm:$0xff] (%p1556_p3)  ;;  %v472_v2 = vld [vmem:[%s435_s18 + $0x30] sm:$0xff] (%p1556_p3)  ;;  %s433_s19 = scalar_lea.vmem (%p1556_p3), [#allocation7], %s1285_s30 }
  0x15   : > { %469 = vst [vmem:[%s433_s19] sm:$0xff] (%p1556_p3), %v468_v0 }
  0x16   : > { %471 = vst [vmem:[%s433_s19 + $0x8] sm:$0xff] %v470_v1 }
  0x17   : > { %473 = vst [vmem:[%s433_s19 + $0x10] sm:$0xff] %v472_v2 }
  0x18 PF: > { %479 = sbr.rel (!%p1556_p3) target bundleno = 32 (0x20), region = 94  ;;  %s481_s24 = sand.u32 (%p1556_p3), 1, %s1429_s21  }
  0x19   : > { %s1229_s25 = sshll.u32 (%p1556_p3), %s1433_s22, 2  ;;  %s1286_s28 = smul.u32 (%p1556_p3), 12, %s481_s24 }
  0x1a   : > { %s485_s29 = scalar_lea.vmem (%p1556_p3), %s1780_s2, %s1229_s25 }
  0x1b   : > { %v502_v3 = vld [vmem:[%s485_s29] sm:$0xf] (%p1556_p3)  ;;  %v504_v4 = vld [vmem:[%s485_s29 + $0xc] sm:$0xf] (%p1556_p3)  ;;  %v506_v5 = vld [vmem:[%s485_s29 + $0x18] sm:$0xf] (%p1556_p3) }
  0x1c   : > { %s483_s30 = scalar_lea.vmem (%p1556_p3), [#allocation8], %s1286_s28 }
  0x1d   : > { %503 = vst [vmem:[%s483_s30] sm:$0xf] %v502_v3 }
  0x1e   : > { %505 = vst [vmem:[%s483_s30 + $0x4] sm:$0xf] %v504_v4 }
  0x1f   : > { %507 = vst [vmem:[%s483_s30 + $0x8] sm:$0xf] %v506_v5 }
  0x20 PF: > { %p1230_p5 = scmp.ge.s32.totalorder %s1433_s22, 1  ;;  %p548_p6 = scmp.lt.s32.totalorder %s1433_s22, 4 }
  0x22   : > { %p549_p7 = pnand %p1230_p5, %p548_p6 }
  0x23   : > { %s555_s23 = sand.u32 (!%p549_p7), 1, %s1425_s20   ;;  %p614_p8 = scmp.lt.s32.totalorder (!%p549_p7), %s1542_s0, 2 }
  0x24   : > { %552 = sbr.rel (%p549_p7) target bundleno = 730 (0x2da), region = 143  ;;  %p1231_p9 = scmp.ne.s32.totalorder (!%p549_p7), %s1542_s0, 0 }
  0x25   : > { %s1287_s26 = smul.u32 (!%p549_p7), 24, %s555_s23 }
  0x26   : > { %s1288_s27 = smul.u32 (!%p549_p7), 12, %s555_s23 }
  0x27   : > { %s557_s28 = scalar_lea.vmem (!%p549_p7), [#allocation7], %s1287_s26 }
  0x28   : > { %s1590_s29 = scalar_lea.vmem (!%p549_p7), [#allocation8], %s1288_s27 }
  0x29   : > { %s1580_s16 = scalar_select %p614_p8, %s1542_s0, 2 }
  0x2a   : > { %624 = sbr.rel (%p1231_p9) target bundleno = 60 (0x3c), region = 155 }
  0x2b   : > { %s616_s19 = scalar_lea.vmem %s1781_s3, %s1580_s16  ;;  %s619_s22 = scalar_lea.vmem %s1782_s4, %s1580_s16 }
  0x2f   : > { %vm625_vm0 = vcmask 7168   ;;  %v1435_v6 = vmov 0.0  }
  0x30   : > { %626 = vst.msk [vmem:[#allocation2] sm:$0xff] %vm625_vm0, %v1435_v6 }
  0x31   : > { %627 = vst.msk [vmem:[#allocation2 + $0x8] sm:$0xff] %vm625_vm0, %v1435_v6 }
  0x32   : > { %628 = vst.msk [vmem:[#allocation2 + $0x10] sm:$0xff] %vm625_vm0, %v1435_v6 }
  0x33   : > { %629 = vst [vmem:[#allocation3 + $0x10] sm:$0xff] %v1435_v6 }
  0x34   : > { %630 = vst [vmem:[#allocation3] sm:$0xff] %v1435_v6 }
  0x35   : > { %631 = vst [vmem:[#allocation3 + $0x8] sm:$0xff] %v1435_v6 }
  0x36   : > { %632 = vst [vmem:[#allocation4 + $0x8] sm:$0xff] %v1435_v6 }
  0x37   : > { %633 = vst [vmem:[#allocation4] sm:$0xff] %v1435_v6 }
  0x38   : > { %634 = vst [vmem:[#allocation4 + $0x10] sm:$0xff] %v1435_v6 }
  0x39   : > { %635 = vst [vmem:[#allocation5 + $0x10] sm:$0xff] %v1435_v6 }
  0x3a   : > { %636 = vst [vmem:[#allocation5] sm:$0xff] %v1435_v6 }
  0x3b   : > { %637 = vst [vmem:[#allocation5 + $0x8] sm:$0xff] %v1435_v6 }
  0x3c PF: > { %v711_v7 = vld [vmem:[%s1787_s9] sm:$0xff]  ;;  %v713_v8 = vld [vmem:[%s1787_s9 + $0x10] sm:$0xff]  ;;  %vm752_vm1 = vcmask 1043456   ;;  %v1436_v10 = vmov 0   ;;  %v712_v20 = vld [vmem:[%s1787_s9 + $0x8] sm:$0xff]  ;;  %vm745_vm2 = vcmask 195584   ;;  %v646_v25 = vlaneseq }
  0x3d   : > { %v1599_v9 = vld [vmem:[%s557_s28 + $0x10] sm:$0xff]  ;;  %1346 = vset.pattern.permute.xlu1 %v1436_v10  ;;  %1345 = vset.pattern.permute.xlu0 %v1436_v10  ;;  %v1606_v12 = vld [vmem:[%s1590_s29 + $0x8] sm:$0xf]  ;;  %v1608_v13 = vld [vmem:[%s557_s28] sm:$0xff]  ;;  %s1437_s23 = smov 1   ;;  %s1438_s17 = smov 127  }
  0x3e   : > { %v706_v11 = vpack.c.bf16 %v1599_v9, %v1599_v9  ;;  %v1610_v14 = vld [vmem:[%s557_s28 + $0x8] sm:$0xff]  ;;  %717 = vperm.xlu1 %1346, %v711_v7   ;;  %727 = vperm.xlu0 %1345, %v713_v8   ;;  %v860_v15 = vunpack.c.l.b16 %v1606_v12  ;;  %v714_v21 = vld [vmem:[%s1787_s9 + $0x18] sm:$0xff]  ;;  %v1632_v26 = vand.u32 127, %v646_v25  ;;  %v675_v30 = vld [vmem:[#allocation2 + $0x10] sm:$0xff]  ;;  %vm810_vm6 = vcmask 261120   ;;  %p1269_p10 = scmp.ne.s32.totalorder %s1542_s0, 2 }
  0x3f   : > { %1347 = vset.pattern.permute.xlu2 %v1436_v10  ;;  %v705_v18 = vpack.c.bf16 %v1610_v14, %v1608_v13  ;;  %v1278_v22 = vld [vmem:[%s1590_s29] sm:$0xff]  ;;  %v1280_v28 = vld [vmem:[%s1783_s5 + $0x8] sm:$0xff]  ;;  %vm992_vm7 = vcmask 7168  }
  0x40   : > { %v754_v16 = vsel %vm752_vm1, %v706_v11, 0  ;;  %v862_v17 = vpack.c.b16 %v860_v15, %v860_v15  ;;  %v1279_v23 = vld [vmem:[%s1783_s5] sm:$0xff]  ;;  %v649_v27 = vcvt.s32.f32 %v1632_v26  ;;  %v1283_v29 = vld [vmem:[%s1785_s7 + $0x8] sm:$0xff]  ;;  %v786_v32 = vld [vmem:[%s1788_s10 + $0x10] sm:$0xff]  ;;  %vm648_vm3 = vcmp.eq.s32.totalorder %v1632_v26, 0 }
  0x41   : > { %762 = vmatpush.bf16.msra.mxu0 %v754_v16  ;;  %v1282_v24 = vld [vmem:[%s1785_s7] sm:$0xff]  ;;  %v674_v31 = vld [vmem:[#allocation2 + $0x8] sm:$0xff]  ;;  %v948_v0 = vld [vmem:[#allocation3] sm:$0xff] }
  0x42   : > { %v871_v19 = vsel %vm752_vm1, %v862_v17, 0  ;;  %652 = vrot.lane.b32.xlu2 %v649_v27, %s1437_s23  ;;  %v785_v33 = vld [vmem:[%s1788_s10 + $0x8] sm:$0xff]  ;;  %v1232_v38 = vadd.f32 -1.0, %v649_v27  ;;  %v1681_v53 = vld [vmem:[%s616_s19] ss:$0 sm:$0xff] }
  0x43   : > { %879 = vmatpush.bf16.msra.mxu2 %v871_v19  ;;  %v949_v63 = vld [vmem:[#allocation3 + $0x8] sm:$0xff] }
  0x44   : > { %v651_v40 = vsel %vm648_vm3, 127.0, %v1232_v38  ;;  %v1349_v48 = vld [vmem:[%s619_s22] ss:$0 sm:$0xff] }
  0x45   : > { %763 = vmatpush.bf16.msra.mxu0 %v705_v18 }
  0x46   : > { %722 = vperm.xlu1 %1346, %v712_v20   ;;  %732 = vperm.xlu0 %1345, %v714_v21   ;;  %v673_v20 = vld [vmem:[#allocation2] sm:$0xff] }
  0x47   : > { %880 = vmatpush.bf16.msra.mxu2 %v1278_v22 }
  0x48   : > { %1241 = vmatmul.msk.bf16.vlgmr.msra.gmra.mxu0 %vm745_vm2, %v1279_v23 }
  0x4a   : > { %1261 = vmatmul.msk.bf16.vlgmr.msra.gmra.mxu2 %vm745_vm2, %v1282_v24  ;;  %655 = vrot.lane.b32.xlu2 %v1608_v13, %s1437_s23 }
  0x4e   : > { %659 = vrot.lane.b32.xlu1 %v1599_v9, %s1437_s23  ;;  %657 = vrot.lane.b32.xlu0 %v1610_v14, %s1437_s23 }
  0x52   : > { %661 = vrot.lane.b32.xlu2 %v1608_v13, %s1438_s17 }
  0x56   : > { %665 = vrot.lane.b32.xlu1 %v1599_v9, %s1438_s17  ;;  %663 = vrot.lane.b32.xlu0 %v1610_v14, %s1438_s17 }
  0x58   : > { %1242 = vmatmul.msk.bf16.gmra.mxu0 %vm745_vm2, %v1280_v28 }
  0x5a   : > { %1262 = vmatmul.msk.bf16.gmra.mxu2 %vm745_vm2, %v1283_v29  ;;  %680 = vperm.xlu2 %1347, %v673_v20  }
  0x5e   : > { %690 = vperm.xlu1 %1346, %v675_v30   ;;  %685 = vperm.xlu0 %1345, %v674_v31  }
  0x66   : > { %799 = vperm.xlu1 %1346, %v786_v32   ;;  %794 = vperm.xlu0 %1345, %v785_v33   ;;  %v1281_v33 = vld [vmem:[%s1784_s6] sm:$0xff] }
  0x6e   : > { %987 = vrot.lane.b32.xlu1 %v1599_v9, %s1437_s23  ;;  %985 = vrot.lane.b32.xlu0 %v1610_v14, %s1437_s23 }
  0x9c   : > { %v653_v39 = vpop.permute.xlu2 %652 }
  0x9d   : > { %vm654_vm4 = vcmp.eq.f32.partialorder %v653_v39, %v651_v40  ;;  %v1284_v39 = vld [vmem:[%s1786_s8] sm:$0xff]  ;;  %v781_v40 = vld [vmem:[%s1784_s6 + $0x8] sm:$0xf] }
  0x9e   : > { %v667_v44 = vsel %vm654_vm4, 1, %v1436_v10 }
  0x9f   : > { %v668_v45 = vperm.slane %v667_v44, 0 }
  0xa1   : > { %vm1668_vm5 = vcmp.eq.s32.totalorder %v668_v45, 1 }
  0xb0   : > { %v718_v34 = vpop.permute.xlu1 %717  ;;  %v728_v35 = vpop.permute.xlu0 %727 }
  0xb8   : > { %v723_v36 = vpop.permute.xlu1 %722  ;;  %v733_v37 = vpop.permute.xlu0 %732 }
  0xc0   : > { %v660_v41 = vpop.permute.xlu1 %659  ;;  %v658_v42 = vpop.permute.xlu0 %657 }
  0xc5   : > { %v765_v43 = vpop.f32.mrf.mxu0 }
  0xc6   : > { %v766_v8 = vadd.f32 %v765_v43, %v718_v34  ;;  %v784_v34 = vld [vmem:[%s1788_s10] sm:$0xff] }
  0xc7   : > { %789 = vperm.xlu2 %1347, %v784_v34  }
  0xc8   : > { %v666_v46 = vpop.permute.xlu1 %665  ;;  %v664_v47 = vpop.permute.xlu0 %663 }
  0xc9   : > { %v672_v51 = vsel %vm1668_vm5, %v660_v41, %v666_v46  ;;  %v671_v52 = vsel %vm1668_vm5, %v658_v42, %v664_v47  ;;  %v807_v41 = vunpack.c.l.b16 %v781_v40  ;;  %v906_v42 = vld [vmem:[%s1786_s8 + $0x8] sm:$0xf]  ;;  %v656_v46 = vpop.permute.xlu2 %655 }
  0xca   : > { %v914_v44 = vunpack.c.l.b16 %v906_v42 }
  0xcb   : > { %v809_v43 = vpack.c.b16 %v807_v41, %v807_v41 }
  0xcc   : > { %v916_v45 = vpack.c.b16 %v914_v44, %v914_v44 }
  0xcd   : > { %v767_v49 = vpop.f32.mrf.mxu0  ;;  %v882_v50 = vpop.f32.mrf.mxu2 }
  0xce   : > { %v768_v5 = vadd.f32 %v767_v49, %v723_v36 }
  0xcf   : > { %983 = vrot.lane.b32.xlu2 %v1608_v13, %s1437_s23  ;;  %s1089_s23 = sld [smem:[#allocation6]] (!%p1269_p10) }
  0xd0   : > { %v691_v54 = vpop.permute.xlu1 %690  ;;  %v686_v55 = vpop.permute.xlu0 %685 }
  0xd1   : > { %v695_v56 = vsel %vm648_vm3, %v691_v54, %v672_v51  ;;  %v694_v57 = vsel %vm648_vm3, %v686_v55, %v671_v52  ;;  %v662_v47 = vpop.permute.xlu2 %661  ;;  %v947_v55 = vld [vmem:[#allocation3 + $0x10] sm:$0xff] }
  0xd2   : > { %v698_v58 = vsub.f32 %v1599_v9, %v695_v56  ;;  %v697_v59 = vsub.f32 %v1610_v14, %v694_v57  ;;  %v670_v49 = vsel %vm1668_vm5, %v656_v46, %v662_v47 }
  0xd4   : > { %v704_v60 = vmul.f32 %v1681_v53, %v698_v58  ;;  %v703_v61 = vmul.f32 %v1681_v53, %v697_v59 }
  0xd5   : > { %v770_v62 = vpop.f32.mrf.mxu0  ;;  %v884_v2 = vpop.f32.mrf.mxu2 }
  0xd6   : > { %v771_v1 = vadd.f32 %v770_v62, %v728_v35  ;;  %v952_v3 = vmul.f32 %v704_v60, %v704_v60  ;;  %v951_v4 = vmul.f32 %v703_v61, %v703_v61 }
  0xd8   : > { %v955_v6 = vadd.f32 %v952_v3, %v949_v63  ;;  %v954_v7 = vadd.f32 %v951_v4, %v948_v0  ;;  %1350 = vtanh.f32 %v771_v1  ;;  %v800_v58 = vpop.permute.xlu1 %799  ;;  %v795_v59 = vpop.permute.xlu0 %794  ;;  %v959_v0 = vld [vmem:[#allocation4 + $0x8] sm:$0xff] }
  0xd9   : > { %1352 = vtanh.f32 %v768_v5 }
  0xda   : > { %958 = vst [vmem:[#allocation3 + $0x8] sm:$0xff] %v955_v6  ;;  %1354 = vtanh.f32 %v766_v8  ;;  %v960_v8 = vld [vmem:[#allocation4] sm:$0xff] }
  0xdb   : > { %957 = vst [vmem:[#allocation3] sm:$0xff] %v954_v7 }
  0xdd   : > { %v772_v9 = vpop.f32.mrf.mxu0  ;;  %v887_v14 = vpop.f32.mrf.mxu2 }
  0xde   : > { %v773_v10 = vadd.f32 %v772_v9, %v733_v37  ;;  %v1351_v11 = vpop.eup %1350 }
  0xdf   : > { %v1353_v15 = vpop.eup %1352  ;;  %v894_v16 = vmul.f32 %v1351_v11, %v1351_v11 }
  0xe0   : > { %1356 = vtanh.f32 %v773_v10  ;;  %v1355_v17 = vpop.eup %1354  ;;  %v893_v18 = vmul.f32 %v1353_v15, %v1353_v15  ;;  %v988_v62 = vpop.permute.xlu1 %987  ;;  %v971_v10 = vld [vmem:[#allocation5 + $0x10] sm:$0xff] }
  0xe1   : > { %v892_v21 = vmul.f32 %v1355_v17, %v1355_v17  ;;  %v898_v22 = vsub.f32 1.0, %v894_v16  ;;  %v782_v32 = vpack.c.bf16 %v1353_v15, %v1355_v17  ;;  %995 = vst.msk [vmem:[#allocation2 + $0x10] sm:$0xff] %vm992_vm7, %v988_v62 }
  0xe2   : > { %v897_v25 = vsub.f32 1.0, %v893_v18 }
  0xe3   : > { %v896_v29 = vsub.f32 1.0, %v892_v21  ;;  %v902_v30 = vmul.f32 %v898_v22, %v887_v14  ;;  %v961_v21 = vld [vmem:[#allocation4 + $0x10] sm:$0xff] }
  0xe4   : > { %v901_v35 = vmul.f32 %v897_v25, %v884_v2  ;;  %v641_v2 = vld [vmem:[%s1590_s29] sm:$0xff]  }
  0xe5   : > { %v889_v28 = vpop.f32.mrf.mxu2  ;;  %v900_v37 = vmul.f32 %v896_v29, %v882_v50  ;;  %v681_v50 = vpop.permute.xlu2 %680  ;;  %v941_v6 = vunpack.c.l.bf16 %v641_v2 }
  0xe6   : > { %v1357_v19 = vpop.eup %1356  ;;  %v693_v51 = vsel %vm648_vm3, %v681_v50, %v670_v49 }
  0xe7   : > { %v895_v23 = vmul.f32 %v1357_v19, %v1357_v19  ;;  %v783_v24 = vpack.c.bf16 %v1357_v19, %v1351_v11  ;;  %v907_v38 = vpack.c.bf16 %v901_v35, %v900_v37  ;;  %v696_v52 = vsub.f32 %v1608_v13, %v693_v51  ;;  %v986_v13 = vpop.permute.xlu0 %985 }
  0xe8   : > { %994 = vst.msk [vmem:[#allocation2 + $0x8] sm:$0xff] %vm992_vm7, %v986_v13  ;;  %v942_v19 = vunpack.c.h.bf16 %v641_v2 }
  0xe9   : > { %v899_v27 = vsub.f32 1.0, %v895_v23  ;;  %823 = vmatpush.bf16.msra.mxu1 %v783_v24  ;;  %v702_v54 = vmul.f32 %v1681_v53, %v696_v52  ;;  %v972_v23 = vld [vmem:[#allocation5] sm:$0xff] }
  0xeb   : > { %v903_v31 = vmul.f32 %v899_v27, %v889_v28  ;;  %v950_v56 = vmul.f32 %v702_v54, %v702_v54 }
  0xed   : > { %824 = vmatpush.bf16.msra.mxu1 %v782_v32  ;;  %v908_v36 = vpack.c.bf16 %v903_v31, %v902_v30  ;;  %v953_v57 = vadd.f32 %v950_v56, %v947_v55  ;;  %v943_v30 = vunpack.c.l.bf16 %v1606_v12  ;;  %v973_v32 = vld [vmem:[#allocation5 + $0x8] sm:$0xff] }
  0xef   : > { %929 = vmatpush.bf16.msra.mxu3 %v908_v36  ;;  %956 = vst [vmem:[#allocation3 + $0x10] sm:$0xff] %v953_v57 }
  0xf0   : > { %1247 = vmatmul.msk.bf16.vlgmr.msra.gmra.mxu1 %vm810_vm6, %v1281_v33 }
  0xf3   : > { %930 = vmatpush.bf16.msra.mxu3 %v907_v38 }
  0xf6   : > { %1267 = vmatmul.msk.bf16.vlgmr.msra.gmra.mxu3 %vm810_vm6, %v1284_v39 }
 0x100   : > { %1248 = vmatmul.msk.bf16.gmra.mxu1 %vm810_vm6, %v809_v43 }
 0x106   : > { %1268 = vmatmul.msk.bf16.gmra.mxu3 %vm810_vm6, %v916_v45 }
 0x121   : > { %v790_v60 = vpop.permute.xlu2 %789 }
 0x129   : > { %v984_v53 = vpop.permute.xlu2 %983 }
 0x12a   : > { %993 = vst.msk [vmem:[#allocation2] sm:$0xff] %vm992_vm7, %v984_v53 }
 0x16d   : > { %v826_v61 = vpop.f32.mrf.mxu1 }
 0x16e   : > { %v827_v26 = vadd.f32 %v826_v61, %v790_v60 }
 0x170   : > { %v838_v63 = vmul.f32 %v1349_v48, %v827_v26 }
 0x172   : > { %v962_v1 = vmul.f32 %v838_v63, %v838_v63 }
 0x174   : > { %v965_v3 = vadd.f32 %v962_v1, %v959_v0 }
 0x175   : > { %v828_v4 = vpop.f32.mrf.mxu1 }
 0x176   : > { %v829_v5 = vadd.f32 %v828_v4, %v795_v59  ;;  %968 = vst [vmem:[#allocation4 + $0x8] sm:$0xff] %v965_v3 }
 0x178   : > { %v839_v7 = vmul.f32 %v1349_v48, %v829_v5 }
 0x179   : > { %v932_v9 = vpop.f32.mrf.mxu3 }
 0x17a   : > { %v963_v11 = vmul.f32 %v839_v7, %v839_v7  ;;  %v944_v14 = vmul.f32 %v941_v6, %v932_v9 }
 0x17c   : > { %v966_v15 = vadd.f32 %v963_v11, %v960_v8  ;;  %v974_v16 = vadd.f32 %v971_v10, %v944_v14 }
 0x17d   : > { %v831_v17 = vpop.f32.mrf.mxu1 }
 0x17e   : > { %969 = vst [vmem:[#allocation4] sm:$0xff] %v966_v15  ;;  %v832_v18 = vadd.f32 %v831_v17, %v800_v58 }
 0x17f   : > { %977 = vst [vmem:[#allocation5 + $0x10] sm:$0xff] %v974_v16 }
 0x180   : > { %v840_v20 = vmul.f32 %v1349_v48, %v832_v18 }
 0x181   : > { %v934_v22 = vpop.f32.mrf.mxu3 }
 0x182   : > { %v964_v24 = vmul.f32 %v840_v20, %v840_v20  ;;  %v945_v25 = vmul.f32 %v942_v19, %v934_v22 }
 0x184   : > { %v967_v27 = vadd.f32 %v964_v24, %v961_v21  ;;  %v975_v28 = vadd.f32 %v972_v23, %v945_v25 }
 0x185   : > { %v833_v29 = vpop.f32.mrf.mxu1 }
 0x186   : > { %970 = vst [vmem:[#allocation4 + $0x10] sm:$0xff] %v967_v27 }
 0x187   : > { %978 = vst [vmem:[#allocation5] sm:$0xff] %v975_v28 }
 0x189   : > { %v937_v31 = vpop.f32.mrf.mxu3 }
 0x18a   : > { %v946_v33 = vmul.f32 %v943_v30, %v937_v31 }
 0x18c   : > { %v976_v34 = vadd.f32 %v973_v32, %v946_v33 }
 0x18d   : > { %999 = sbr.rel (%p1269_p10) target bundleno = 718 (0x2ce), region = 159 }
 0x18e   : > { %979 = vst [vmem:[#allocation5 + $0x8] sm:$0xff] %v976_v34 }
 0x191   : > { %v939_v35 = vpop.f32.mrf.mxu3 }
 0x192   : > { %v1040_v36 = vld [vmem:[%s1790_s12] sm:$0xff]  ;;  %v1439_v38 = vmov 0   ;;  %v1005_v12 = vld [vmem:[%s1789_s11 + $0x10] sm:$0xff]  ;;  %v1041_v39 = vld [vmem:[%s1790_s12 + $0x8] sm:$0xff] }
 0x193   : > { %v1003_v37 = vld [vmem:[%s1789_s11] sm:$0xff]  ;;  %1359 = vset.pattern.permute.xlu1 %v1439_v38  ;;  %1358 = vset.pattern.permute.xlu0 %v1439_v38  ;;  %v1004_v40 = vld [vmem:[%s1789_s11 + $0x8] sm:$0xff]  ;;  %v1042_v41 = vld [vmem:[%s1790_s12 + $0x10] sm:$0xff] }
 0x194   : > { %1045 = vperm.xlu1 %1359, %v1040_v36   ;;  %1008 = vperm.xlu0 %1358, %v1003_v37   ;;  %v1074_v42 = vld [vmem:[#allocation5 + $0x10] sm:$0xff]  ;;  %v1075_v43 = vld [vmem:[#allocation5] sm:$0xff]  ;;  %v1038_v54 = vld [vmem:[#allocation4] sm:$0xff] }
 0x195   : > { %1360 = vset.pattern.permute.xlu2 %v1439_v38  ;;  %v1077_v44 = vadd.f32 %v1075_v43, %v1074_v42  ;;  %v1076_v45 = vld [vmem:[#allocation5 + $0x8] sm:$0xff]  ;;  %v1037_v51 = vld [vmem:[#allocation4 + $0x8] sm:$0xff]  ;;  %v1000_v52 = vld [vmem:[#allocation3 + $0x10] sm:$0xff] }
 0x196   : > { %1018 = vperm.xlu2 %1360, %v1005_v12   ;;  %v1001_v55 = vld [vmem:[#allocation3] sm:$0xff]  ;;  %v1002_v57 = vld [vmem:[#allocation3 + $0x8] sm:$0xff] }
 0x197   : > { %v1078_v46 = vadd.f32 %v1077_v44, %v1076_v45  ;;  %v1039_v58 = vld [vmem:[#allocation4 + $0x10] sm:$0xff] }
 0x19c   : > { %1050 = vperm.xlu1 %1359, %v1041_v39   ;;  %1013 = vperm.xlu0 %1358, %v1004_v40  }
 0x19e   : > { %1055 = vperm.xlu2 %1360, %v1042_v41  }
 0x1c7   : > { %1079 = vadd.xlane.f32.xlu2 %v1078_v46 }
 0x1f0   : > { %v1019_v47 = vpop.permute.xlu2 %1018 }
 0x1f1   : > { %v1023_v13 = vmul.f32 %v1019_v47, %v1002_v57 }
 0x1f8   : > { %v1056_v56 = vpop.permute.xlu2 %1055 }
 0x1f9   : > { %v1060_v53 = vmul.f32 %v1056_v56, %v1039_v58 }
 0x206   : > { %v1046_v49 = vpop.permute.xlu1 %1045  ;;  %v1009_v50 = vpop.permute.xlu0 %1008 }
 0x207   : > { %v1058_v61 = vmul.f32 %v1046_v49, %v1037_v51  ;;  %v1021_v48 = vmul.f32 %v1009_v50, %v1000_v52 }
 0x20e   : > { %v1051_v59 = vpop.permute.xlu1 %1050  ;;  %v1014_v60 = vpop.permute.xlu0 %1013 }
 0x20f   : > { %v1059_v26 = vmul.f32 %v1051_v59, %v1038_v54  ;;  %v1022_v62 = vmul.f32 %v1014_v60, %v1001_v55 }
 0x211   : > { %v1061_v63 = vadd.f32 %v1059_v26, %v1058_v61  ;;  %v1024_v0 = vadd.f32 %v1022_v62, %v1021_v48 }
 0x213   : > { %v1062_v1 = vadd.f32 %v1061_v63, %v1060_v53  ;;  %v1025_v2 = vadd.f32 %v1024_v0, %v1023_v13 }
 0x215   : > { %1063 = vadd.xlane.f32.xlu1 %v1062_v1  ;;  %1026 = vadd.xlane.f32.xlu0 %v1025_v2 }
 0x23a   : > { %v1080_v3 = vpop.xlane.xlu2 %1079 }
 0x23b   : > { %v1081_v4 = vrot.slane %v1080_v3, 4 }
 0x23d   : > { %v1082_v5 = vadd.f32 %v1081_v4, %v1080_v3 }
 0x23f   : > { %v1083_v8 = vrot.slane %v1082_v5, 2 }
 0x241   : > { %v1084_v15 = vadd.f32 %v1083_v8, %v1082_v5 }
 0x243   : > { %v1085_v22 = vrot.slane %v1084_v15, 1 }
 0x245   : > { %v1086_v25 = vadd.f32 %v1085_v22, %v1084_v15 }
 0x288   : > { %v1064_v6 = vpop.xlane.xlu1 %1063  ;;  %v1027_v7 = vpop.xlane.xlu0 %1026 }
 0x289   : > { %v1065_v9 = vrot.slane %v1064_v6, 4  ;;  %v1028_v10 = vrot.slane %v1027_v7, 4 }
 0x28b   : > { %v1066_v11 = vadd.f32 %v1065_v9, %v1064_v6  ;;  %v1029_v14 = vadd.f32 %v1028_v10, %v1027_v7 }
 0x28d   : > { %v1067_v16 = vrot.slane %v1066_v11, 2  ;;  %v1030_v17 = vrot.slane %v1029_v14, 2 }
 0x28f   : > { %v1068_v18 = vadd.f32 %v1067_v16, %v1066_v11  ;;  %v1031_v19 = vadd.f32 %v1030_v17, %v1029_v14 }
 0x291   : > { %v1032_v20 = vrot.slane %v1031_v19, 1  ;;  %v1069_v21 = vrot.slane %v1068_v18, 1 }
 0x293   : > { %v1033_v23 = vadd.f32 %v1032_v20, %v1031_v19  ;;  %v1070_v24 = vadd.f32 %v1069_v21, %v1068_v18 }
 0x295   : > { %1289 = vpush %v1033_v23 }
 0x296   : > { %1291 = vpush %v1070_v24 }
 0x297   : > { %1293 = vpush %v1086_v25 }
 0x2c6   : > { %s1290_s19 = spop %1289 }
 0x2c7   : > { %1036 = sst [smem:[#allocation9]] %s1290_s19  ;;  %s1292_s16 = spop %1291 }
 0x2c8   : > { %1073 = sst [smem:[#allocation11]] %s1292_s16  ;;  %s1294_s22 = spop %1293 }
 0x2c9   : > { %s1088_s29 = ssub.f32 0.0, %s1294_s22 }
 0x2cb   : > { %s1090_s17 = smul.f32 %s1089_s23, %s1088_s29 }
 0x2cd   : > { %1092 = sst [smem:[#allocation13]] %s1090_s17 }
 0x2ce PF: > { %p1307_p11 = scmp.eq.s32.totalorder %s1542_s0, 2  ;;  %s1109_s25 = sshll.u32 %s1792_s14, 4  ;;  %s1110_s25 = int_to_ptr.hbm [resolvable:$true] %s1109_s25 }
 0x2cf   : > { %s1440_s28 = smov [#allocation11]   ;;  %s1099_s26 = sshll.u32 %s1791_s13, 4  ;;  %s1100_s26 = int_to_ptr.hbm [resolvable:$true] %s1099_s26 }
 0x2d0   : > { %1298 = dma.smem_to_hbm (%p1307_p11), %s1440_s28, 16, %s1110_s25, [#allocation12]  }
 0x2d1   : > { %s1119_s19 = sshll.u32 %s1793_s15, 4  ;;  %s1441_s16 = smov [#allocation9]   ;;  %s1120_s19 = int_to_ptr.hbm [resolvable:$true] %s1119_s19 }
 0x2d2   : > { %1296 = dma.smem_to_hbm (%p1307_p11), %s1441_s16, 16, %s1100_s26, [#allocation10]  }
 0x2d3   : > { %s1442_s22 = smov [#allocation13]  }
 0x2d4   : > { %1300 = dma.smem_to_hbm (%p1307_p11), %s1442_s22, 16, %s1120_s19, [#allocation12]  }
 0x2d5   : > { %1416 = dma.done.wait (%p1307_p11), [#allocation10], 16  }
 0x2d6   : > { %1418 = vsyncadd (%p1307_p11), [#allocation10], 4294967280 }
 0x2d7   : > { %1420 = dma.done.wait (%p1307_p11), [#allocation12], 32  }
 0x2d8   : > { %1422 = vsyncadd (%p1307_p11), [#allocation12], 4294967264 }
 0x2d9   : > { %1138 = sfence }
 0x2da PF: > { %s1801_s22 = sld [smem:[#allocation16_spill]]  ;;  %s1803_s20 = smov %s1429_s21 }
 0x2db   : > { %s1802_s29 = sld [smem:[#allocation17_spill]] }
 0x2e0   : > { %p26_p12 = scmp.ge.s32.totalorder %s1801_s22, 5  }
 0x2e1   : > { %s1804_s21 = smov %s1802_s29 }
 0x2e2   :  { %28 = sbr.rel (!%p26_p12) target bundleno = 5 (0x5), region = 224 }
 0x2e7   :  { %1144 = vsyncpa [#allocation10], 1 }
 0x2e8   :  { %1146 = vsyncpa [#allocation10 + $0x1], 1 }
 0x2e9   :  { %1147 = vsyncpa [#allocation12], 1 }

</bundles_post_ra>
